<compile_context>
chip_gen: v7x
topology: tpu7x:2x2x1
jax: 0.10.0
libtpu: 0.0.40
codegen_flags: <defaults>
</compile_context>

<pallas_src>
import functools
import math
import numbers

import jax
import jax.numpy as jnp
from jax.experimental import pallas as pl
from jax.experimental.pallas import tpu as pltpu


# ----------------------------------------------------------------------------
# Parameter construction (matches the PyTorch __init__ exactly, dim=2).
# ----------------------------------------------------------------------------
def make_gaussian_weight(channels, kernel_size, sigma, dim=2):
    if isinstance(kernel_size, numbers.Number):
        kernel_size = [kernel_size] * dim
    if isinstance(sigma, numbers.Number):
        sigma = [float(sigma)] * dim
    kernel = jnp.ones((), dtype=jnp.float32)
    meshgrids = jnp.meshgrid(
        *[jnp.arange(size, dtype=jnp.float32) for size in kernel_size],
        indexing="ij",  # torch.meshgrid default is 'ij'
    )
    for size, std, mgrid in zip(kernel_size, sigma, meshgrids):
        mean = (size - 1) / 2
        kernel = kernel * (
            1.0 / (std * math.sqrt(2 * math.pi))
            * jnp.exp(-(((mgrid - mean) / std) ** 2) / 2)
        )
    kernel = kernel / jnp.sum(kernel)
    kernel = kernel.reshape((1, 1) + kernel.shape)          # (1, 1, K, K)
    kernel = jnp.tile(kernel, (channels, 1) + (1,) * dim)   # (C, 1, K, K)
    return kernel


# ----------------------------------------------------------------------------
# Pallas kernel: separable depthwise 2-D "valid" convolution on a block of
# (Cb, H, W) channel slabs.  The 1-D taps live in SMEM (read as scalars).
# ----------------------------------------------------------------------------
def _gauss2d_separable_kernel(x_ref, ky_ref, kx_ref, o_ref):
    # x_ref : (Cb, H, W)   input block (fused N*C channels)
    # ky_ref: (K,)  SMEM   vertical 1-D taps
    # kx_ref: (K,)  SMEM   horizontal 1-D taps
    # o_ref : (Cb, Ho, Wo) output block, Ho = H-K+1, Wo = W-K+1
    _, ho, wo = o_ref.shape
    k = ky_ref.shape[0]

    x = x_ref[...].astype(jnp.float32)          # single upcast per block

    # Vertical 1-D pass: K shifted adds along H (sublane axis).
    t = ky_ref[0] * x[:, 0:ho, :]
    for dy in range(1, k):
        t = t + ky_ref[dy] * x[:, dy:dy + ho, :]

    # Horizontal 1-D pass: K shifted adds along W (lane axis).
    acc = kx_ref[0] * t[:, :, 0:wo]
    for dx in range(1, k):
        acc = acc + kx_ref[dx] * t[:, :, dx:dx + wo]

    o_ref[...] = acc.astype(o_ref.dtype)


def _choose_channel_block(nc, h, w, ho, wo, in_bytes, out_bytes,
                          budget_bytes=24 * 1024 * 1024):
    """Pick a channel-block size (and padding) whose footprint fits VMEM.

    Footprint per channel slab: double-buffered input + one f32 upcast copy
    + vertical-pass intermediate + accumulator + double-buffered output.
    Returns (block, channel_pad) so that (nc + channel_pad) % block == 0.
    """
    per_ch = (2 * in_bytes * h * w        # pipelined input buffers
              + 4 * h * w                 # f32 upcast copy
              + 4 * ho * w                # vertical-pass intermediate
              + 4 * ho * wo               # f32 accumulator
              + 2 * out_bytes * ho * wo)  # pipelined output buffers
    ideal = max(1, min(nc, budget_bytes // max(per_ch, 1)))
    # Prefer an exact divisor near the ideal block (no channel padding).
    cb = ideal
    while nc % cb:
        cb -= 1
    if cb >= max(1, ideal // 2):
        return cb, 0
    # Divisor search degraded too much (e.g. prime nc): pad channels instead.
    pad = (-nc) % ideal
    return ideal, pad


# ----------------------------------------------------------------------------
# Wrapper matching GaussianSmoothing.forward(input, padding=False).
# ----------------------------------------------------------------------------
@functools.partial(jax.jit, static_argnames=("padding",))
def gaussian_smoothing(x, weight, padding=False):
    """x: (N, C, H, W); weight: (C, 1, K, K) built by make_gaussian_weight.

    Depthwise 'valid' Gaussian conv (groups=C).  The Gaussian weight is
    identical for every channel and separable (outer product) by
    construction, which this implementation exploits.
    """
    k = weight.shape[-1]
    if padding:
        # NB: for even K this yields H+1/W+1 outputs (p = k//2), mirroring the
        # PyTorch module.  jnp.pad(mode='reflect') requires p < H and p < W.
        p = k // 2
        x = jnp.pad(x, ((0, 0), (0, 0), (p, p), (p, p)), mode="reflect")

    n, c, h, w = x.shape
    if k > h or k > w:
        raise ValueError("kernel_size larger than (padded) spatial dims")
    ho, wo = h - k + 1, w - k + 1

    # Recover the 1-D taps from the 2-D outer-product kernel (channel 0 — all
    # channels carry the identical Gaussian).  Row/col sums of an outer
    # product reproduce the factors exactly (up to the total-sum normalizer).
    w2 = weight[0, 0].astype(jnp.float32)           # (K, K)
    ky = jnp.sum(w2, axis=1)                        # (K,) vertical taps
    kx = jnp.sum(w2, axis=0) / jnp.sum(w2)          # (K,) horizontal taps

    nc = n * c
    x_flat = x.reshape(nc, h, w)
    in_bytes = jnp.dtype(x.dtype).itemsize
    cb, ch_pad = _choose_channel_block(nc, h, w, ho, wo, in_bytes, in_bytes)
    if ch_pad:
        x_flat = jnp.pad(x_flat, ((0, ch_pad), (0, 0), (0, 0)))
    nct = nc + ch_pad
    grid = (nct // cb,)

    out = pl.pallas_call(
        _gauss2d_separable_kernel,
        out_shape=jax.ShapeDtypeStruct((nct, ho, wo), x.dtype),
        grid=grid,
        in_specs=[
            pl.BlockSpec((cb, h, w), lambda i: (i, 0, 0)),
            pl.BlockSpec(memory_space=pltpu.MemorySpace.SMEM),   # ky (resident)
            pl.BlockSpec(memory_space=pltpu.MemorySpace.SMEM),   # kx (resident)
        ],
        out_specs=pl.BlockSpec((cb, ho, wo), lambda i: (i, 0, 0)),
        compiler_params=pltpu.CompilerParams(
            dimension_semantics=("parallel",),
            vmem_limit_bytes=48 * 1024 * 1024,
        ),
    )(x_flat, ky, kx)

    if ch_pad:
        out = out[:nc]
    return out.reshape(n, c, ho, wo)


# ----------------------------------------------------------------------------
# Pure-JAX reference (lax depthwise conv) for a correctness check.
# ----------------------------------------------------------------------------
def _ref_depthwise_conv2d(x, weight):
    c = x.shape[1]
    return jax.lax.conv_general_dilated(
        x, weight,
        window_strides=(1, 1), padding="VALID",
        dimension_numbers=("NCHW", "OIHW", "NCHW"),
        feature_group_count=c,
    )


if __name__ == "__main__":
    key = jax.random.PRNGKey(0)
    N, C, H, W = 2, 4, 16, 16
    kernel_size, sigma = 3, 1.0

    x = jax.random.normal(key, (N, C, H, W), dtype=jnp.float32)
    weight = make_gaussian_weight(C, kernel_size, sigma, dim=2)

    # padding=False path (default forward)
    out = gaussian_smoothing(x, weight, padding=False)
    out = jax.block_until_ready(out)
    ref = _ref_depthwise_conv2d(x, weight)
    assert out.shape == (N, C, H - kernel_size + 1, W - kernel_size + 1)
    assert jnp.allclose(out, ref, atol=2e-5, rtol=2e-5)

    # padding=True path (reflect pad, output same spatial size for odd K)
    out_pad = gaussian_smoothing(x, weight, padding=True)
    out_pad = jax.block_until_ready(out_pad)
    p = int(kernel_size / 2)
    x_pad = jnp.pad(x, ((0, 0), (0, 0), (p, p), (p, p)), mode="reflect")
    ref_pad = _ref_depthwise_conv2d(x_pad, weight)
    assert out_pad.shape == (N, C, H, W)
    assert jnp.allclose(out_pad, ref_pad, atol=2e-5, rtol=2e-5)

    print("KERNEL_OK")
</pallas_src>

<mosaic_0001>
module attributes {stable_mosaic.version = 11 : i64} {
  func.func @_gauss2d_separable_kernel(%arg0: i32, %arg1: memref<8x16x16xf32, #tpu.memory_space<vmem>>, %arg2: memref<3xf32, #tpu.memory_space<smem>>, %arg3: memref<3xf32, #tpu.memory_space<smem>>, %arg4: memref<8x14x14xf32, #tpu.memory_space<vmem>>) attributes {dimension_semantics = [#tpu.dimension_semantics<parallel>], iteration_bounds = array<i64: 1>, scalar_prefetch = 0 : i64, scratch_operands = 0 : i64, tpu.core_type = #tpu.core_type<tc>, window_params = [{transform_indices = @transform_0, window_bounds = array<i64: 8, 16, 16>}, {transform_indices = @transform_1, window_bounds = array<i64: 3>}, {transform_indices = @transform_2, window_bounds = array<i64: 3>}, {transform_indices = @transform_3, window_bounds = array<i64: 8, 14, 14>}]} {
    %c0 = arith.constant 0 : index
    %c0_0 = arith.constant 0 : index
    %c0_1 = arith.constant 0 : index
    %0 = vector.load %arg1[%c0, %c0_0, %c0_1] : memref<8x16x16xf32, #tpu.memory_space<vmem>>, vector<8x16x16xf32>
    %c0_2 = arith.constant 0 : index
    %1 = memref.load %arg2[%c0_2] : memref<3xf32, #tpu.memory_space<smem>>
    %2 = vector.extract_strided_slice %0 {offsets = [0, 0, 0], sizes = [8, 14, 16], strides = [1, 1, 1]} : vector<8x16x16xf32> to vector<8x14x16xf32>
    %3 = vector.broadcast %1 : f32 to vector<8x14x16xf32>
    %4 = arith.mulf %3, %2 : vector<8x14x16xf32>
    %c1 = arith.constant 1 : index
    %5 = memref.load %arg2[%c1] : memref<3xf32, #tpu.memory_space<smem>>
    %6 = vector.extract_strided_slice %0 {offsets = [0, 1, 0], sizes = [8, 14, 16], strides = [1, 1, 1]} : vector<8x16x16xf32> to vector<8x14x16xf32>
    %7 = vector.broadcast %5 : f32 to vector<8x14x16xf32>
    %8 = arith.mulf %7, %6 : vector<8x14x16xf32>
    %9 = arith.addf %4, %8 : vector<8x14x16xf32>
    %c2 = arith.constant 2 : index
    %10 = memref.load %arg2[%c2] : memref<3xf32, #tpu.memory_space<smem>>
    %11 = vector.extract_strided_slice %0 {offsets = [0, 2, 0], sizes = [8, 14, 16], strides = [1, 1, 1]} : vector<8x16x16xf32> to vector<8x14x16xf32>
    %12 = vector.broadcast %10 : f32 to vector<8x14x16xf32>
    %13 = arith.mulf %12, %11 : vector<8x14x16xf32>
    %14 = arith.addf %9, %13 : vector<8x14x16xf32>
    %c0_3 = arith.constant 0 : index
    %15 = memref.load %arg3[%c0_3] : memref<3xf32, #tpu.memory_space<smem>>
    %16 = vector.extract_strided_slice %14 {offsets = [0, 0, 0], sizes = [8, 14, 14], strides = [1, 1, 1]} : vector<8x14x16xf32> to vector<8x14x14xf32>
    %17 = vector.broadcast %15 : f32 to vector<8x14x14xf32>
    %18 = arith.mulf %17, %16 : vector<8x14x14xf32>
    %c1_4 = arith.constant 1 : index
    %19 = memref.load %arg3[%c1_4] : memref<3xf32, #tpu.memory_space<smem>>
    %20 = vector.extract_strided_slice %14 {offsets = [0, 0, 1], sizes = [8, 14, 14], strides = [1, 1, 1]} : vector<8x14x16xf32> to vector<8x14x14xf32>
    %21 = vector.broadcast %19 : f32 to vector<8x14x14xf32>
    %22 = arith.mulf %21, %20 : vector<8x14x14xf32>
    %23 = arith.addf %18, %22 : vector<8x14x14xf32>
    %c2_5 = arith.constant 2 : index
    %24 = memref.load %arg3[%c2_5] : memref<3xf32, #tpu.memory_space<smem>>
    %25 = vector.extract_strided_slice %14 {offsets = [0, 0, 2], sizes = [8, 14, 14], strides = [1, 1, 1]} : vector<8x14x16xf32> to vector<8x14x14xf32>
    %26 = vector.broadcast %24 : f32 to vector<8x14x14xf32>
    %27 = arith.mulf %26, %25 : vector<8x14x14xf32>
    %28 = arith.addf %23, %27 : vector<8x14x14xf32>
    %c0_6 = arith.constant 0 : index
    %c0_7 = arith.constant 0 : index
    %c0_8 = arith.constant 0 : index
    %29 = vector.load %arg4[%c0_6, %c0_7, %c0_8] : memref<8x14x14xf32, #tpu.memory_space<vmem>>, vector<8x14x14xf32>
    tpu.vector_store %arg4[%c0_6, %c0_7, %c0_8], %28 {strides = array<i32>} : memref<8x14x14xf32, #tpu.memory_space<vmem>>, vector<8x14x14xf32>,
    return
  }
  func.func @transform_0(%arg0: i32) -> (i32, i32, i32) {
    %c0_i32 = arith.constant 0 : i32
    %c0_i32_0 = arith.constant 0 : i32
    %c0_i32_1 = arith.constant 0 : i32
    return %arg0, %c0_i32, %c0_i32_0 : i32, i32, i32
  }
  func.func @transform_1(%arg0: i32) -> i32 {
    %c0_i32 = arith.constant 0 : i32
    %c0_i32_0 = arith.constant 0 : i32
    return %c0_i32 : i32
  }
  func.func @transform_2(%arg0: i32) -> i32 {
    %c0_i32 = arith.constant 0 : i32
    %c0_i32_0 = arith.constant 0 : i32
    return %c0_i32 : i32
  }
  func.func @transform_3(%arg0: i32) -> (i32, i32, i32) {
    %c0_i32 = arith.constant 0 : i32
    %c0_i32_0 = arith.constant 0 : i32
    %c0_i32_1 = arith.constant 0 : i32
    return %arg0, %c0_i32, %c0_i32_0 : i32, i32, i32
  }
}

</mosaic_0001>

<bundles_post_ra>
// kernel: gaussian_smoothing.1
= control target key start
LH: loop header
LB: loop body
LE: loop exit
PB: predicated region body
PF: predicated region fallthrough
CT: control target
= control target key end

     0   :  { %8 = vsyncpa [#allocation3], 0  ;;  %s927_s0 = inlined_call_operand.hbm [shape: f32[8,16,16], index: 0, kind: input, shape index: {}]   ;;  %s928_s1 = inlined_call_operand.vmem [shape: f32[3], index: 1, kind: input, shape index: {}]   ;;  %s929_s2 = inlined_call_operand.vmem [shape: f32[3], index: 2, kind: input, shape index: {}]   ;;  %s930_s3 = inlined_call_operand.vmem [shape: f32[8,14,14], index: 3, kind: output, shape index: {}]  }
   0x1   :  { %9 = vsyncpa [#allocation4], 0 }
   0x2   :  { %10 = vsyncpa [#allocation7], 0  ;;  %s571_s12 = smov [#allocation2]   ;;  %s29_s16 = sshll.u32 %s928_s1, 4  ;;  %s30_s16 = int_to_ptr.vmem [resolvable:$true] %s29_s16 }
   0x3   :  { %s16_s13 = sshll.u32 %s571_s12, 4  ;;  %s519_s19 = scalar_lea.hbm %s927_s0, 2048  ;;  %s17_s13 = int_to_ptr.vmem [resolvable:$true] %s16_s13 }
   0x4   :  { %p520_p0 = scmp.ne.s32.totalorder %s927_s0, %s519_s19  ;;  %p523_p1 = scmp.lt.u32.totalorder %s519_s19, %s927_s0 }
   0x6   :  { %p525_p2 = pnand %p523_p1, %p520_p0 }
   0x8   :  { %528 = shalt.err (!%p525_p2)
}
   0x9   :  { %s529_s24 = scalar_lea.vmem %s17_s13, 2048  ;;  %p534_p4 = scmp.lt.s32.totalorder %s17_s13, %s17_s13 }
   0xa   :  { %p530_p3 = scmp.ne.s32.totalorder %s17_s13, %s529_s24  ;;  %p535_p5 = scmp.lt.s32.totalorder %s529_s24, %s529_s24 }
   0xc   :  { %p536_p6 = por %p535_p5, %p534_p4 }
   0xe   :  { %p537_p7 = pnand %p536_p6, %p530_p3 }
  0x10   :  { %540 = shalt.err (!%p537_p7)
}
  0x11   :  { %s572_s1 = smov 128   ;;  %s573_s25 = smov 8  }
  0x12   :  { %22 = dma.hbm_to_vmem [thread:$0]  %s927_s0, 2048, %s17_s13, [#allocation3], %s572_s1, %s572_s1, %s573_s25  }
  0x13   :  { %s541_s28 = scalar_lea.vmem %s30_s16, 16  ;;  %p546_p9 = scmp.lt.s32.totalorder %s30_s16, %s30_s16 }
  0x14   :  { %p542_p8 = scmp.ne.s32.totalorder %s30_s16, %s541_s28  ;;  %p547_p10 = scmp.lt.s32.totalorder %s541_s28, %s541_s28 }
  0x16   :  { %p548_p11 = por %p547_p10, %p546_p9 }
  0x18   :  { %p549_p12 = pnand %p548_p11, %p542_p8 }
  0x1a   :  { %552 = shalt.err (!%p549_p12)
}
  0x1b   :  { %s574_s29 = smov [#allocation5]   ;;  %s39_s5 = sshll.u32 %s929_s2, 4  ;;  %s40_s5 = int_to_ptr.vmem [resolvable:$true] %s39_s5 }
  0x1c   :  { %32 = dma.vmem_to_smem %s30_s16, 16, %s574_s29, [#allocation4]  }
  0x1d   :  { %s553_s6 = scalar_lea.vmem %s40_s5, 16  ;;  %p558_p0 = scmp.lt.s32.totalorder %s40_s5, %s40_s5 }
  0x1e   :  { %p554_p13 = scmp.ne.s32.totalorder %s40_s5, %s553_s6  ;;  %p559_p1 = scmp.lt.s32.totalorder %s553_s6, %s553_s6 }
  0x20   :  { %p560_p2 = por %p559_p1, %p558_p0 }
  0x22   :  { %p561_p3 = pnand %p560_p2, %p554_p13 }
  0x24   :  { %564 = shalt.err (!%p561_p3)
}
  0x25   :  { %s575_s0 = smov [#allocation6]  }
  0x26   :  { %42 = dma.vmem_to_smem %s40_s5, 16, %s575_s0, [#allocation7]  }
  0x27   :  { %565 = dma.done.wait [#allocation3], 2048  }
  0x28   :  { %566 = vsyncadd [#allocation3], 4294965248 }
  0x29   :  { %567 = dma.done.wait [#allocation4], 16  }
  0x2a   :  { %568 = vsyncadd [#allocation4], 4294967280 }
  0x2b   :  { %569 = dma.done.wait [#allocation7], 16  }
  0x2c   :  { %570 = vsyncadd [#allocation7], 4294967280 }
  0x2d   :  { %52 = sfence }
  0x2e   :  { %s69_s7 = sld [smem:[#allocation5]]  ;;  %s508_s8 = sld [smem:[#allocation5 + $0x1]]  ;;  %v56_v0 = vld [vmem:[#allocation2 + $0x18] sm:$0xff]  ;;  %v54_v1 = vld [vmem:[#allocation2 + $0x8] sm:$0xff]  ;;  %vm121_vm0 = vcmask 1046528   ;;  %vm212_vm1 = vcmask 1045504  }
  0x2f   :  { %s509_s2 = sld [smem:[#allocation5 + $0x2]]  ;;  %s510_s9 = sld [smem:[#allocation6 + $0x1]]  ;;  %v58_v4 = vld [vmem:[#allocation2 + $0x28] sm:$0xff]  ;;  %v53_v13 = vld [vmem:[#allocation2] sm:$0xff]  ;;  %v60_v18 = vld [vmem:[#allocation2 + $0x38] sm:$0xff]  ;;  %vm485_vm2 = vcmask 111616  }
  0x30   :  { %v57_v35 = vld [vmem:[#allocation2 + $0x20] sm:$0xff]  ;;  %v62_v44 = vld [vmem:[#allocation2 + $0x48] sm:$0xff]  ;;  %v59_v49 = vld [vmem:[#allocation2 + $0x30] sm:$0xff]  ;;  %s576_s10 = smov 127   ;;  %s742_s11 = sld [smem:[#allocation6 + $0x2]]  ;;  %vm483_vm3 = vcmask 113664  }
  0x31   :  { %v55_v62 = vld [vmem:[#allocation2 + $0x10] sm:$0xff]  ;;  %s577_s12 = smov 126   ;;  %s269_s13 = sld [smem:[#allocation6]] }
  0x34   :  { %v616_v2 = vstv %s69_s7  ;;  %v618_v3 = vstv %s508_s8 }
  0x35   :  { %v74_v5 = vmul.f32 %v616_v2, %v56_v0  ;;  %v622_v6 = vmul.f32 %v618_v3, %v56_v0  ;;  %v624_v7 = vstv %s509_s2  ;;  %v626_v8 = vstv %s510_s9 }
  0x36   :  { %v629_v9 = vmul.f32 %v624_v7, %v56_v0  ;;  %v72_v10 = vmul.f32 %v616_v2, %v54_v1  ;;  %v90_v11 = vmul.f32 %v618_v3, %v54_v1  ;;  %v181_v12 = vmul.f32 %v624_v7, %v54_v1 }
  0x37   :  { %v126_v14 = vrot.slane %v622_v6, 1  ;;  %v76_v15 = vmul.f32 %v616_v2, %v58_v4  ;;  %v94_v16 = vmul.f32 %v618_v3, %v58_v4  ;;  %v185_v17 = vmul.f32 %v624_v7, %v58_v4 }
  0x38   :  { %v217_v19 = vrot.slane %v629_v9, 2  ;;  %v123_v20 = vrot.slane %v90_v11, 1  ;;  %v214_v21 = vrot.slane %v181_v12, 2  ;;  %v71_v22 = vmul.f32 %v616_v2, %v53_v13 }
  0x39   :  { %v165_v23 = vadd.f32 %v126_v14, %v74_v5  ;;  %v129_v24 = vrot.slane %v94_v16, 1  ;;  %v220_v25 = vrot.slane %v185_v17, 2  ;;  %v89_v26 = vmul.f32 %v618_v3, %v53_v13 }
  0x3a   :  { %v163_v27 = vadd.f32 %v123_v20, %v72_v10  ;;  %v180_v28 = vmul.f32 %v624_v7, %v53_v13  ;;  %v78_v29 = vmul.f32 %v616_v2, %v60_v18  ;;  %v96_v30 = vmul.f32 %v618_v3, %v60_v18 }
  0x3b   :  { %v648_v31 = vadd.f32 %v217_v19, %v165_v23  ;;  %v167_v32 = vadd.f32 %v129_v24, %v76_v15  ;;  %v122_v33 = vrot.slane %v89_v26, 1  ;;  %v187_v34 = vmul.f32 %v624_v7, %v60_v18  ;;  %v61_v18 = vld [vmem:[#allocation2 + $0x40] sm:$0xff] }
  0x3c   :  { %v651_v36 = vadd.f32 %v214_v21, %v163_v27  ;;  %v213_v37 = vrot.slane %v180_v28, 2  ;;  %v132_v38 = vrot.slane %v96_v30, 1  ;;  %v75_v39 = vmul.f32 %v616_v2, %v57_v35 }
  0x3d   :  { %v292_v40 = vmul.f32 %v626_v8, %v648_v31  ;;  %v656_v41 = vadd.f32 %v220_v25, %v167_v32  ;;  %v124_v42 = vsel %vm121_vm0, %v122_v33, %v123_v20  ;;  %v223_v43 = vrot.slane %v187_v34, 2  ;;  %v64_v33 = vld [vmem:[#allocation2 + $0x58] sm:$0xff] }
  0x3e   :  { %v290_v45 = vmul.f32 %v626_v8, %v651_v36  ;;  %v162_v46 = vadd.f32 %v124_v42, %v71_v22  ;;  %v215_v47 = vsel %vm212_vm1, %v213_v37, %v214_v21  ;;  %v169_v48 = vadd.f32 %v132_v38, %v78_v29 }
  0x3f   :  { %327 = vrot.lane.b32.xlu1 %v292_v40, %s576_s10  ;;  %v294_v50 = vmul.f32 %v626_v8, %v656_v41  ;;  %v93_v51 = vmul.f32 %v618_v3, %v57_v35  ;;  %v184_v52 = vmul.f32 %v624_v7, %v57_v35  ;;  %v80_v53 = vmul.f32 %v616_v2, %v62_v44 }
  0x40   :  { %323 = vrot.lane.b32.xlu0 %v290_v45, %s576_s10  ;;  %v669_v54 = vadd.f32 %v215_v47, %v162_v46  ;;  %v671_v55 = vadd.f32 %v223_v43, %v169_v48  ;;  %v98_v56 = vmul.f32 %v618_v3, %v62_v44  ;;  %v189_v57 = vmul.f32 %v624_v7, %v62_v44  ;;  %v63_v44 = vld [vmem:[#allocation2 + $0x50] sm:$0xff] }
  0x41   :  { %v128_v58 = vrot.slane %v93_v51, 1  ;;  %v219_v59 = vrot.slane %v184_v52, 2  ;;  %v77_v60 = vmul.f32 %v616_v2, %v59_v49  ;;  %v95_v61 = vmul.f32 %v618_v3, %v59_v49 }
  0x42   :  { %v289_v63 = vmul.f32 %v626_v8, %v669_v54  ;;  %v296_v0 = vmul.f32 %v626_v8, %v671_v55  ;;  %v135_v1 = vrot.slane %v98_v56, 1  ;;  %v226_v4 = vrot.slane %v189_v57, 2  ;;  %v65_v56 = vld [vmem:[#allocation2 + $0x60] sm:$0xff] }
  0x43   :  { %331 = vrot.lane.b32.xlu1 %v294_v50, %s576_s10  ;;  %v130_v5 = vsel %vm121_vm0, %v128_v58, %v129_v24  ;;  %v221_v10 = vsel %vm212_vm1, %v219_v59, %v220_v25  ;;  %v131_v11 = vrot.slane %v95_v61, 1  ;;  %v186_v12 = vmul.f32 %v624_v7, %v59_v49 }
  0x44   :  { %321 = vrot.lane.b32.xlu0 %v289_v63, %s576_s10  ;;  %v166_v13 = vadd.f32 %v130_v5, %v75_v39  ;;  %v171_v15 = vadd.f32 %v135_v1, %v80_v53  ;;  %v73_v16 = vmul.f32 %v616_v2, %v55_v62  ;;  %v91_v17 = vmul.f32 %v618_v3, %v55_v62 }
  0x45   :  { %v133_v20 = vsel %vm121_vm0, %v131_v11, %v132_v38  ;;  %v222_v21 = vrot.slane %v186_v12, 2  ;;  %v182_v22 = vmul.f32 %v624_v7, %v55_v62  ;;  %v79_v23 = vmul.f32 %v616_v2, %v61_v18  ;;  %v68_v11 = vld [vmem:[#allocation2 + $0x78] sm:$0xff] }
  0x46   :  { %v691_v24 = vadd.f32 %v221_v10, %v166_v13  ;;  %v693_v25 = vadd.f32 %v226_v4, %v171_v15  ;;  %v168_v26 = vadd.f32 %v133_v20, %v77_v60  ;;  %v125_v27 = vrot.slane %v91_v17, 1 }
  0x47   :  { %335 = vrot.lane.b32.xlu1 %v296_v0, %s576_s10  ;;  %v224_v28 = vsel %vm212_vm1, %v222_v21, %v223_v43  ;;  %v216_v29 = vrot.slane %v182_v22, 2  ;;  %v97_v30 = vmul.f32 %v618_v3, %v61_v18  ;;  %v188_v32 = vmul.f32 %v624_v7, %v61_v18 }
  0x48   :  { %v293_v34 = vmul.f32 %v626_v8, %v691_v24  ;;  %v298_v35 = vmul.f32 %v626_v8, %v693_v25  ;;  %v703_v37 = vadd.f32 %v224_v28, %v168_v26  ;;  %v127_v38 = vsel %vm121_vm0, %v125_v27, %v126_v14  ;;  %v66_v14 = vld [vmem:[#allocation2 + $0x68] sm:$0xff]  ;;  %v67_v28 = vld [vmem:[#allocation2 + $0x70] sm:$0xff] }
  0x49   :  { %v164_v39 = vadd.f32 %v127_v38, %v73_v16  ;;  %v218_v40 = vsel %vm212_vm1, %v216_v29, %v217_v19  ;;  %v134_v42 = vrot.slane %v97_v30, 1  ;;  %v225_v43 = vrot.slane %v188_v32, 2 }
  0x4a   :  { %329 = vrot.lane.b32.xlu0 %v293_v34, %s576_s10  ;;  %v295_v45 = vmul.f32 %v626_v8, %v703_v37  ;;  %v82_v46 = vmul.f32 %v616_v2, %v64_v33  ;;  %v100_v47 = vmul.f32 %v618_v3, %v64_v33  ;;  %v191_v6 = vmul.f32 %v624_v7, %v64_v33 }
  0x4b   :  { %339 = vrot.lane.b32.xlu1 %v298_v35, %s576_s10  ;;  %v718_v9 = vadd.f32 %v218_v40, %v164_v39  ;;  %v136_v19 = vsel %vm121_vm0, %v134_v42, %v135_v1  ;;  %v227_v48 = vsel %vm212_vm1, %v225_v43, %v226_v4  ;;  %v81_v49 = vmul.f32 %v616_v2, %v63_v44 }
  0x4c   :  { %v170_v50 = vadd.f32 %v136_v19, %v79_v23  ;;  %v138_v51 = vrot.slane %v100_v47, 1  ;;  %v229_v52 = vrot.slane %v191_v6, 2  ;;  %v99_v53 = vmul.f32 %v618_v3, %v63_v44 }
  0x4d   :  { %v291_v57 = vmul.f32 %v626_v8, %v718_v9  ;;  %v190_v58 = vmul.f32 %v624_v7, %v63_v44  ;;  %v84_v59 = vmul.f32 %v616_v2, %v66_v14  ;;  %v102_v60 = vmul.f32 %v618_v3, %v66_v14 }
  0x4e   :  { %333 = vrot.lane.b32.xlu0 %v295_v45, %s576_s10  ;;  %v730_v61 = vadd.f32 %v227_v48, %v170_v50  ;;  %v173_v62 = vadd.f32 %v138_v51, %v82_v46  ;;  %v137_v63 = vrot.slane %v99_v53, 1  ;;  %v193_v0 = vmul.f32 %v624_v7, %v66_v14 }
  0x4f   :  { %325 = vrot.lane.b32.xlu1 %v291_v57, %s576_s10  ;;  %v228_v1 = vrot.slane %v190_v58, 2  ;;  %v141_v4 = vrot.slane %v102_v60, 1  ;;  %v83_v5 = vmul.f32 %v616_v2, %v65_v56  ;;  %v101_v10 = vmul.f32 %v618_v3, %v65_v56 }
  0x50   :  { %v297_v12 = vmul.f32 %v626_v8, %v730_v61  ;;  %v738_v13 = vadd.f32 %v229_v52, %v173_v62  ;;  %v139_v15 = vsel %vm121_vm0, %v137_v63, %v138_v51  ;;  %v232_v16 = vrot.slane %v193_v0, 2 }
  0x51   :  { %v172_v17 = vadd.f32 %v139_v15, %v81_v49  ;;  %v230_v18 = vsel %vm212_vm1, %v228_v1, %v229_v52  ;;  %v175_v20 = vadd.f32 %v141_v4, %v84_v59  ;;  %v140_v21 = vrot.slane %v101_v10, 1 }
  0x52   :  { %337 = vrot.lane.b32.xlu0 %v297_v12, %s576_s10  ;;  %v300_v22 = vmul.f32 %v626_v8, %v738_v13  ;;  %v192_v23 = vmul.f32 %v624_v7, %v65_v56  ;;  %v86_v26 = vmul.f32 %v616_v2, %v68_v11  ;;  %v104_v27 = vmul.f32 %v618_v3, %v68_v11 }
  0x53   :  { %v750_v29 = vadd.f32 %v230_v18, %v172_v17  ;;  %v752_v30 = vadd.f32 %v232_v16, %v175_v20  ;;  %v142_v32 = vsel %vm121_vm0, %v140_v21, %v141_v4  ;;  %v195_v33 = vmul.f32 %v624_v7, %v68_v11 }
  0x54   :  { %343 = vrot.lane.b32.xlu1 %v300_v22, %s576_s10  ;;  %v174_v34 = vadd.f32 %v142_v32, %v83_v5  ;;  %v231_v35 = vrot.slane %v192_v23, 2  ;;  %v144_v38 = vrot.slane %v104_v27, 1  ;;  %v103_v43 = vmul.f32 %v618_v3, %v67_v28 }
  0x55   :  { %v299_v39 = vmul.f32 %v626_v8, %v750_v29  ;;  %v302_v40 = vmul.f32 %v626_v8, %v752_v30  ;;  %v235_v42 = vrot.slane %v195_v33, 2  ;;  %v85_v46 = vmul.f32 %v616_v2, %v67_v28 }
  0x56   :  { %v233_v44 = vsel %vm212_vm1, %v231_v35, %v232_v16  ;;  %v177_v45 = vadd.f32 %v144_v38, %v86_v26  ;;  %v194_v47 = vmul.f32 %v624_v7, %v67_v28  ;;  %v143_v14 = vrot.slane %v103_v43, 1 }
  0x57   :  { %341 = vrot.lane.b32.xlu0 %v299_v39, %s576_s10  ;;  %v766_v6 = vadd.f32 %v233_v44, %v174_v34  ;;  %v386_v50 = vstv %s742_s11  ;;  %v819_v34 = vstv %s269_s13 }
  0x58   :  { %347 = vrot.lane.b32.xlu1 %v302_v40, %s576_s10  ;;  %v769_v19 = vadd.f32 %v235_v42, %v177_v45  ;;  %v234_v48 = vrot.slane %v194_v47, 2  ;;  %v145_v49 = vsel %vm121_vm0, %v143_v14, %v144_v38  ;;  %v388_v53 = vmul.f32 %v386_v50, %v651_v36 }
  0x59   :  { %v301_v3 = vmul.f32 %v626_v8, %v766_v6  ;;  %v176_v7 = vadd.f32 %v145_v49, %v85_v46  ;;  %v387_v57 = vmul.f32 %v386_v50, %v669_v54  ;;  %v390_v58 = vmul.f32 %v386_v50, %v648_v31 }
  0x5a   :  { %v304_v2 = vmul.f32 %v626_v8, %v769_v19  ;;  %v236_v51 = vsel %vm212_vm1, %v234_v48, %v235_v42  ;;  %v389_v59 = vmul.f32 %v386_v50, %v718_v9  ;;  %v392_v60 = vmul.f32 %v386_v50, %v656_v41 }
  0x5b   :  { %345 = vrot.lane.b32.xlu0 %v301_v3, %s576_s10  ;;  %v780_v52 = vadd.f32 %v236_v51, %v176_v7  ;;  %v394_v62 = vmul.f32 %v386_v50, %v671_v55  ;;  %v393_v63 = vmul.f32 %v386_v50, %v703_v37  ;;  %v396_v0 = vmul.f32 %v386_v50, %v693_v25 }
  0x5c   :  { %351 = vrot.lane.b32.xlu1 %v304_v2, %s576_s10  ;;  %v395_v1 = vmul.f32 %v386_v50, %v730_v61  ;;  %v398_v4 = vmul.f32 %v386_v50, %v738_v13  ;;  %v397_v5 = vmul.f32 %v386_v50, %v750_v29  ;;  %v400_v10 = vmul.f32 %v386_v50, %v752_v30 }
  0x5d   :  { %v303_v56 = vmul.f32 %v626_v8, %v780_v52  ;;  %v391_v8 = vmul.f32 %v386_v50, %v691_v24  ;;  %v399_v11 = vmul.f32 %v386_v50, %v766_v6  ;;  %v402_v12 = vmul.f32 %v386_v50, %v769_v19 }
  0x5e   :  { %v401_v15 = vmul.f32 %v386_v50, %v780_v52  ;;  %v272_v38 = vmul.f32 %v819_v34, %v651_v36  ;;  %v274_v42 = vmul.f32 %v819_v34, %v648_v31  ;;  %v271_v44 = vmul.f32 %v819_v34, %v669_v54 }
  0x5f   :  { %349 = vrot.lane.b32.xlu0 %v303_v56, %s576_s10  ;;  %v276_v36 = vmul.f32 %v819_v34, %v656_v41  ;;  %v273_v3 = vmul.f32 %v819_v34, %v718_v9  ;;  %v278_v7 = vmul.f32 %v819_v34, %v671_v55  ;;  %v275_v41 = vmul.f32 %v819_v34, %v691_v24 }
  0x60   :  { %421 = vrot.lane.b32.xlu1 %v388_v53, %s577_s12  ;;  %v280_v24 = vmul.f32 %v819_v34, %v693_v25  ;;  %v279_v25 = vmul.f32 %v819_v34, %v730_v61  ;;  %v281_v61 = vmul.f32 %v819_v34, %v750_v29 }
  0x63   :  { %419 = vrot.lane.b32.xlu0 %v387_v57, %s577_s12 }
  0x64   :  { %425 = vrot.lane.b32.xlu1 %v390_v58, %s577_s12 }
  0x67   :  { %423 = vrot.lane.b32.xlu0 %v389_v59, %s577_s12  ;;  %v277_v59 = vmul.f32 %v819_v34, %v703_v37  ;;  %v282_v37 = vmul.f32 %v819_v34, %v738_v13  ;;  %v284_v13 = vmul.f32 %v819_v34, %v752_v30  ;;  %v283_v30 = vmul.f32 %v819_v34, %v766_v6 }
  0x68   :  { %429 = vrot.lane.b32.xlu1 %v392_v60, %s577_s12 }
  0x6b   :  { %427 = vrot.lane.b32.xlu0 %v391_v8, %s577_s12 }
  0x6c   :  { %433 = vrot.lane.b32.xlu1 %v394_v62, %s577_s12 }
  0x6f   :  { %431 = vrot.lane.b32.xlu0 %v393_v63, %s577_s12 }
  0x70   :  { %437 = vrot.lane.b32.xlu1 %v396_v0, %s577_s12 }
  0x73   :  { %435 = vrot.lane.b32.xlu0 %v395_v1, %s577_s12 }
  0x74   :  { %441 = vrot.lane.b32.xlu1 %v398_v4, %s577_s12 }
  0x77   :  { %439 = vrot.lane.b32.xlu0 %v397_v5, %s577_s12 }
  0x78   :  { %445 = vrot.lane.b32.xlu1 %v400_v10, %s577_s12 }
  0x7b   :  { %443 = vrot.lane.b32.xlu0 %v399_v11, %s577_s12 }
  0x7c   :  { %449 = vrot.lane.b32.xlu1 %v402_v12, %s577_s12 }
  0x7f   :  { %447 = vrot.lane.b32.xlu0 %v401_v15, %s577_s12 }
  0xb1   :  { %v328_v16 = vpop.permute.xlu1 %327 }
  0xb2   :  { %v324_v17 = vpop.permute.xlu0 %323  ;;  %v372_v14 = vadd.f32 %v328_v16, %v274_v42 }
  0xb3   :  { %v370_v43 = vadd.f32 %v324_v17, %v272_v38 }
  0xb5   :  { %v332_v18 = vpop.permute.xlu1 %331 }
  0xb6   :  { %v322_v20 = vpop.permute.xlu0 %321  ;;  %v374_v2 = vadd.f32 %v332_v18, %v276_v36 }
  0xb7   :  { %v369_v48 = vadd.f32 %v322_v20, %v271_v44 }
  0xb9   :  { %v336_v21 = vpop.permute.xlu1 %335 }
  0xba   :  { %v376_v58 = vadd.f32 %v336_v21, %v278_v7 }
  0xbc   :  { %v330_v22 = vpop.permute.xlu0 %329 }
  0xbd   :  { %v340_v23 = vpop.permute.xlu1 %339  ;;  %v373_v55 = vadd.f32 %v330_v22, %v275_v41  ;;  %v286_v22 = vmul.f32 %v819_v34, %v769_v19  ;;  %v285_v19 = vmul.f32 %v819_v34, %v780_v52 }
  0xbe   :  { %v378_v0 = vadd.f32 %v340_v23, %v280_v24 }
  0xc0   :  { %v334_v26 = vpop.permute.xlu0 %333 }
  0xc1   :  { %v326_v27 = vpop.permute.xlu1 %325  ;;  %v375_v1 = vadd.f32 %v334_v26, %v277_v59 }
  0xc2   :  { %v371_v51 = vadd.f32 %v326_v27, %v273_v3 }
  0xc4   :  { %v338_v28 = vpop.permute.xlu0 %337 }
  0xc5   :  { %v377_v12 = vadd.f32 %v338_v28, %v279_v25 }
  0xc6   :  { %v344_v32 = vpop.permute.xlu1 %343 }
  0xc7   :  { %v380_v15 = vadd.f32 %v344_v32, %v282_v37 }
  0xc9   :  { %v817_v33 = vpop.permute.xlu0 %341 }
  0xca   :  { %v348_v35 = vpop.permute.xlu1 %347  ;;  %v379_v21 = vadd.f32 %v817_v33, %v281_v61 }
  0xcb   :  { %v382_v29 = vadd.f32 %v348_v35, %v284_v13 }
  0xcd   :  { %v823_v39 = vpop.permute.xlu0 %345 }
  0xce   :  { %v825_v40 = vpop.permute.xlu1 %351  ;;  %v381_v32 = vadd.f32 %v823_v39, %v283_v30 }
  0xcf   :  { %v384_v6 = vadd.f32 %v825_v40, %v286_v22 }
  0xd1   :  { %v831_v45 = vpop.permute.xlu0 %349 }
  0xd2   :  { %v422_v46 = vpop.permute.xlu1 %421  ;;  %v383_v39 = vadd.f32 %v831_v45, %v285_v19 }
  0xd3   :  { %v468_v47 = vadd.f32 %v422_v46, %v370_v43 }
  0xd5   :  { %486 = vst.msk [vmem:[%s930_s3 + $0x8] sm:$0x3f] %vm485_vm2, %v468_v47  ;;  %v420_v31 = vpop.permute.xlu0 %419 }
  0xd6   :  { %v426_v54 = vpop.permute.xlu1 %425  ;;  %v467_v49 = vadd.f32 %v420_v31, %v369_v48 }
  0xd7   :  { %v470_v50 = vadd.f32 %v426_v54, %v372_v14 }
  0xd8   :  { %484 = vst.msk [vmem:[%s930_s3] sm:$0xff] %vm483_vm3, %v467_v49 }
  0xd9   :  { %488 = vst.msk [vmem:[%s930_s3 + $0x18] sm:$0x3f] %vm485_vm2, %v470_v50  ;;  %v424_v9 = vpop.permute.xlu0 %423 }
  0xda   :  { %v430_v53 = vpop.permute.xlu1 %429  ;;  %v469_v56 = vadd.f32 %v424_v9, %v371_v51 }
  0xdb   :  { %v472_v57 = vadd.f32 %v430_v53, %v374_v2 }
  0xdc   :  { %487 = vst.msk [vmem:[%s930_s3 + $0x10] sm:$0xff] %vm483_vm3, %v469_v56 }
  0xdd   :  { %490 = vst.msk [vmem:[%s930_s3 + $0x28] sm:$0x3f] %vm485_vm2, %v472_v57  ;;  %v428_v60 = vpop.permute.xlu0 %427 }
  0xde   :  { %v434_v8 = vpop.permute.xlu1 %433  ;;  %v471_v62 = vadd.f32 %v428_v60, %v373_v55 }
  0xdf   :  { %v474_v63 = vadd.f32 %v434_v8, %v376_v58 }
  0xe0   :  { %489 = vst.msk [vmem:[%s930_s3 + $0x20] sm:$0xff] %vm483_vm3, %v471_v62 }
  0xe1   :  { %492 = vst.msk [vmem:[%s930_s3 + $0x38] sm:$0x3f] %vm485_vm2, %v474_v63  ;;  %v432_v4 = vpop.permute.xlu0 %431 }
  0xe2   :  { %v438_v5 = vpop.permute.xlu1 %437  ;;  %v473_v10 = vadd.f32 %v432_v4, %v375_v1 }
  0xe3   :  { %v476_v11 = vadd.f32 %v438_v5, %v378_v0 }
  0xe4   :  { %491 = vst.msk [vmem:[%s930_s3 + $0x30] sm:$0xff] %vm483_vm3, %v473_v10 }
  0xe5   :  { %494 = vst.msk [vmem:[%s930_s3 + $0x48] sm:$0x3f] %vm485_vm2, %v476_v11  ;;  %v436_v16 = vpop.permute.xlu0 %435 }
  0xe6   :  { %v442_v17 = vpop.permute.xlu1 %441  ;;  %v475_v18 = vadd.f32 %v436_v16, %v377_v12 }
  0xe7   :  { %v478_v20 = vadd.f32 %v442_v17, %v380_v15 }
  0xe8   :  { %493 = vst.msk [vmem:[%s930_s3 + $0x40] sm:$0xff] %vm483_vm3, %v475_v18 }
  0xe9   :  { %496 = vst.msk [vmem:[%s930_s3 + $0x58] sm:$0x3f] %vm485_vm2, %v478_v20  ;;  %v440_v23 = vpop.permute.xlu0 %439 }
  0xea   :  { %v446_v26 = vpop.permute.xlu1 %445  ;;  %v477_v27 = vadd.f32 %v440_v23, %v379_v21 }
  0xeb   :  { %v480_v28 = vadd.f32 %v446_v26, %v382_v29 }
  0xec   :  { %495 = vst.msk [vmem:[%s930_s3 + $0x50] sm:$0xff] %vm483_vm3, %v477_v27 }
  0xed   :  { %498 = vst.msk [vmem:[%s930_s3 + $0x68] sm:$0x3f] %vm485_vm2, %v480_v28  ;;  %v444_v33 = vpop.permute.xlu0 %443 }
  0xee   :  { %v450_v35 = vpop.permute.xlu1 %449  ;;  %v479_v38 = vadd.f32 %v444_v33, %v381_v32 }
  0xef   :  { %v482_v42 = vadd.f32 %v450_v35, %v384_v6 }
  0xf0   :  { %497 = vst.msk [vmem:[%s930_s3 + $0x60] sm:$0xff] %vm483_vm3, %v479_v38 }
  0xf1   :  { %500 = vst.msk [vmem:[%s930_s3 + $0x78] sm:$0x3f] %vm485_vm2, %v482_v42  ;;  %v448_v52 = vpop.permute.xlu0 %447 }
  0xf2   :  { %v481_v34 = vadd.f32 %v448_v52, %v383_v39 }
  0xf4   :  { %499 = vst.msk [vmem:[%s930_s3 + $0x70] sm:$0xff] %vm483_vm3, %v481_v34 }
  0xf5   :  { %505 = vsyncpa [#allocation3], 1 }
  0xf6   :  { %506 = vsyncpa [#allocation4], 1 }
  0xf7   :  { %507 = vsyncpa [#allocation7], 1 }

</bundles_post_ra>
